<compile_context>
chip_gen: v6e
topology: v6e:2x2x1
jax: 0.10.0
libtpu: 0.0.40
codegen_flags: <defaults>
</compile_context>

<pallas_src>
import functools

import jax
import jax.numpy as jnp
from jax.experimental import pallas as pl
from jax.experimental.pallas import tpu as pltpu


# ----------------------------------------------------------------------------
# Pallas kernel: fused W_folded @ patches + shift, then LeakyReLU(0.2)
# ----------------------------------------------------------------------------
def _fused_conv_bn_lrelu_kernel(w_ref, p_ref, shift_ref, o_ref):
    # w_ref:     (OC, K)  conv weight with BN scale folded in
    # p_ref:     (K, M)   im2col patches, M = N*OH*OW in the lane dimension
    # shift_ref: (OC, 1)  folded shift ((conv_bias - mean) * scale + beta)
    # o_ref:     (OC, M)
    acc = jnp.dot(w_ref[...], p_ref[...], preferred_element_type=jnp.float32)
    y = acc + shift_ref[...]
    o_ref[...] = jnp.where(y >= 0.0, y, 0.2 * y).astype(o_ref.dtype)


def _fused_matmul(w_scaled, patches, shift):
    """w_scaled: (OC, K) f32, patches: (K, M) f32, shift: (OC, 1) f32."""
    oc, k = w_scaled.shape
    m = patches.shape[1]

    return pl.pallas_call(
        _fused_conv_bn_lrelu_kernel,
        out_shape=jax.ShapeDtypeStruct((oc, m), jnp.float32),
        grid=(1,),  # single grid step: entire layer fits VMEM on all gens
        in_specs=[
            pl.BlockSpec((oc, k), lambda i: (0, 0)),   # folded weights (full)
            pl.BlockSpec((k, m), lambda i: (0, 0)),    # patches (full)
            pl.BlockSpec((oc, 1), lambda i: (0, 0)),   # per-channel shift
        ],
        out_specs=pl.BlockSpec((oc, m), lambda i: (0, 0)),
        compiler_params=pltpu.CompilerParams(
            dimension_semantics=("arbitrary",)),
    )(w_scaled, patches, shift)


# ----------------------------------------------------------------------------
# Glue: im2col in channel-major (C, N, H, W) layout, parameter folding
# ----------------------------------------------------------------------------
def _im2col_cnhw(x, kh, kw, stride, padding):
    """x: (C, N, H, W) -> patches (C*KH*KW, N*OH*OW), plus (OH, OW).

    K ordering is (c, ki, kj), matching w.reshape(oc, c*kh*kw).
    M ordering is (n, oh, ow), so the kernel output reshapes directly to the
    next layer's (C, N, H, W) input layout with no transpose.
    """
    c, n, h, w = x.shape
    xp = jnp.pad(x, ((0, 0), (0, 0), (padding, padding), (padding, padding)))
    hp, wp = h + 2 * padding, w + 2 * padding
    oh = (hp - kh) // stride + 1
    ow = (wp - kw) // stride + 1

    cols = []
    for ki in range(kh):
        for kj in range(kw):
            sl = xp[:, :, ki:ki + stride * oh:stride, kj:kj + stride * ow:stride]
            cols.append(sl)  # (C, N, OH, OW)
    stacked = jnp.stack(cols, axis=1)                        # (C, KH*KW, N, OH, OW)
    patches = stacked.reshape(c * kh * kw, n * oh * ow)      # (K, M)
    return patches, oh, ow


def conv_bn_lrelu_block(x_cnhw, params, *, stride, padding):
    """One [Conv2d -> Dropout(id) -> BatchNorm2d -> LeakyReLU(0.2)] block.

    x_cnhw: (C, N, H, W) float32 (channel-major internal layout).
    params: dict with w (OC,C,KH,KW), b (OC,), gamma, beta, mean, var (OC,).
    Returns (OC, N, OH, OW) float32.
    """
    w, b = params["w"], params["b"]
    gamma, beta = params["gamma"], params["beta"]
    mean, var = params["mean"], params["var"]
    eps = 1e-5

    oc, c, kh, kw = w.shape
    n = x_cnhw.shape[1]

    patches, oh, ow = _im2col_cnhw(x_cnhw, kh, kw, stride, padding)  # (K, M)

    # Fold conv bias + BatchNorm into the weights (scale) and a shift.
    scale = gamma / jnp.sqrt(var + eps)                              # (OC,)
    w_scaled = (w.reshape(oc, c * kh * kw)
                * scale[:, None]).astype(jnp.float32)                # (OC, K)
    shift = ((b - mean) * scale + beta).reshape(oc, 1).astype(jnp.float32)

    out = _fused_matmul(w_scaled, patches, shift)                    # (OC, M)
    return out.reshape(oc, n, oh, ow)                                # (OC, N, OH, OW)


# ----------------------------------------------------------------------------
# Classifier: parameter init + forward
# ----------------------------------------------------------------------------
def init_classifier_params(key, channels, kernels):
    """Deterministic parameter init matching the module's shapes."""
    params = []
    in_ch = 1
    for oc, k in zip(channels, kernels):
        key, kw_, kb_, kg_, kbt_, km_, kv_ = jax.random.split(key, 7)
        fan_in = in_ch * k * k
        bound = 1.0 / jnp.sqrt(fan_in)
        params.append({
            "w": jax.random.uniform(kw_, (oc, in_ch, k, k), jnp.float32,
                                    -bound, bound),
            "b": jax.random.uniform(kb_, (oc,), jnp.float32, -bound, bound),
            "gamma": 1.0 + 0.1 * jax.random.normal(kg_, (oc,), jnp.float32),
            "beta": 0.1 * jax.random.normal(kbt_, (oc,), jnp.float32),
            "mean": 0.1 * jax.random.normal(km_, (oc,), jnp.float32),
            "var": jnp.abs(1.0 + 0.1 * jax.random.normal(kv_, (oc,),
                                                         jnp.float32)),
        })
        in_ch = oc
    return params


@functools.partial(jax.jit, static_argnames=("kernels", "paddings"))
def classifier_forward(x_nchw, params, kernels, paddings):
    # Strides: 2,2,2,2,2,1  (as in the nn.Sequential definition).
    strides = (2, 2, 2, 2, 2, 1)
    # TODO(synk): Dropout is a no-op at inference; train-mode dropout masking
    # and batch-stat BatchNorm are not implemented (eval mode only).
    x = jnp.transpose(x_nchw, (1, 0, 2, 3))    # NCHW -> (C, N, H, W), once
    for p, s, pad in zip(params, strides, paddings):
        x = conv_bn_lrelu_block(x, p, stride=s, padding=pad)
    return jnp.transpose(x, (1, 0, 2, 3))      # back to NCHW, once


if __name__ == "__main__":
    # Hyperparameters consistent with the module's __init__ signature.
    channels = (4, 8, 8, 16, 16, 8)
    kernels = (3, 3, 3, 3, 3, 3)
    paddings = (1, 1, 1, 1, 1, 1)

    key = jax.random.PRNGKey(0)
    key, kx = jax.random.split(key)
    # Input is NCHW with in_channels=1 (first conv has in_channels=1).
    x = jax.random.normal(kx, (2, 1, 64, 64), jnp.float32)

    params = init_classifier_params(key, channels, kernels)

    out = classifier_forward(x, params, kernels, paddings)
    out = jax.block_until_ready(out)

    # Expected output shape: 64 /2/2/2/2/2 = 2, last conv stride 1 -> (2, 8, 2, 2).
    assert out.shape == (2, channels[-1], 2, 2), out.shape
    assert jnp.all(jnp.isfinite(out))
    print("KERNEL_OK")
</pallas_src>

<mosaic_0001>
module attributes {stable_mosaic.version = 11 : i64} {
  func.func @_fused_conv_bn_lrelu_kernel(%arg0: i32, %arg1: memref<4x9xf32, #tpu.memory_space<vmem>>, %arg2: memref<9x2048xf32, #tpu.memory_space<vmem>>, %arg3: memref<4x1xf32, #tpu.memory_space<vmem>>, %arg4: memref<4x2048xf32, #tpu.memory_space<vmem>>) attributes {dimension_semantics = [#tpu.dimension_semantics<arbitrary>], iteration_bounds = array<i64: 1>, scalar_prefetch = 0 : i64, scratch_operands = 0 : i64, tpu.core_type = #tpu.core_type<tc>, window_params = [{pipeline_mode = #tpu.pipeline_mode<synchronous>, transform_indices = @transform_0, window_bounds = array<i64: 4, 9>}, {pipeline_mode = #tpu.pipeline_mode<synchronous>, transform_indices = @transform_1, window_bounds = array<i64: 9, 2048>}, {pipeline_mode = #tpu.pipeline_mode<synchronous>, transform_indices = @transform_2, window_bounds = array<i64: 4, 1>}, {pipeline_mode = #tpu.pipeline_mode<synchronous>, transform_indices = @transform_3, window_bounds = array<i64: 4, 2048>}]} {
    %c0 = arith.constant 0 : index
    %c0_0 = arith.constant 0 : index
    %0 = vector.load %arg1[%c0, %c0_0] : memref<4x9xf32, #tpu.memory_space<vmem>>, vector<4x9xf32>
    %c0_1 = arith.constant 0 : index
    %c0_2 = arith.constant 0 : index
    %1 = vector.load %arg2[%c0_1, %c0_2] : memref<9x2048xf32, #tpu.memory_space<vmem>>, vector<9x2048xf32>
    %cst = arith.constant dense<0.000000e+00> : vector<4x2048xf32>
    %2 = tpu.matmul %0, %1, %cst {dimension_numbers = #tpu.dot_dimension_numbers<[1], [0], [0], [1], [0, 0, 1, 1], [], []>} : vector<4x9xf32>, vector<9x2048xf32>, vector<4x2048xf32> -> vector<4x2048xf32>
    %c0_3 = arith.constant 0 : index
    %c0_4 = arith.constant 0 : index
    %3 = vector.load %arg3[%c0_3, %c0_4] : memref<4x1xf32, #tpu.memory_space<vmem>>, vector<4x1xf32>
    %4 = vector.broadcast %3 : vector<4x1xf32> to vector<4x2048xf32>
    %5 = arith.addf %2, %4 : vector<4x2048xf32>
    %cst_5 = arith.constant 0.000000e+00 : f32
    %6 = vector.broadcast %cst_5 : f32 to vector<4x2048xf32>
    %7 = arith.cmpf oge, %5, %6 : vector<4x2048xf32>
    %cst_6 = arith.constant 2.000000e-01 : f32
    %8 = vector.broadcast %cst_6 : f32 to vector<4x2048xf32>
    %9 = arith.mulf %8, %5 : vector<4x2048xf32>
    %10 = arith.select %7, %5, %9 : vector<4x2048xi1>, vector<4x2048xf32>
    %c0_7 = arith.constant 0 : index
    %c0_8 = arith.constant 0 : index
    %11 = vector.load %arg4[%c0_7, %c0_8] : memref<4x2048xf32, #tpu.memory_space<vmem>>, vector<4x2048xf32>
    tpu.vector_store %arg4[%c0_7, %c0_8], %10 {strides = array<i32>} : memref<4x2048xf32, #tpu.memory_space<vmem>>, vector<4x2048xf32>,
    return
  }
  func.func @transform_0(%arg0: i32) -> (i32, i32) {
    %c0_i32 = arith.constant 0 : i32
    %c0_i32_0 = arith.constant 0 : i32
    %c0_i32_1 = arith.constant 0 : i32
    return %c0_i32, %c0_i32_0 : i32, i32
  }
  func.func @transform_1(%arg0: i32) -> (i32, i32) {
    %c0_i32 = arith.constant 0 : i32
    %c0_i32_0 = arith.constant 0 : i32
    %c0_i32_1 = arith.constant 0 : i32
    return %c0_i32, %c0_i32_0 : i32, i32
  }
  func.func @transform_2(%arg0: i32) -> (i32, i32) {
    %c0_i32 = arith.constant 0 : i32
    %c0_i32_0 = arith.constant 0 : i32
    %c0_i32_1 = arith.constant 0 : i32
    return %c0_i32, %c0_i32_0 : i32, i32
  }
  func.func @transform_3(%arg0: i32) -> (i32, i32) {
    %c0_i32 = arith.constant 0 : i32
    %c0_i32_0 = arith.constant 0 : i32
    %c0_i32_1 = arith.constant 0 : i32
    return %c0_i32, %c0_i32_0 : i32, i32
  }
}

module attributes {stable_mosaic.version = 11 : i64} {
  func.func @_fused_conv_bn_lrelu_kernel(%arg0: i32, %arg1: memref<8x36xf32, #tpu.memory_space<vmem>>, %arg2: memref<36x512xf32, #tpu.memory_space<vmem>>, %arg3: memref<8x1xf32, #tpu.memory_space<vmem>>, %arg4: memref<8x512xf32, #tpu.memory_space<vmem>>) attributes {dimension_semantics = [#tpu.dimension_semantics<arbitrary>], iteration_bounds = array<i64: 1>, scalar_prefetch = 0 : i64, scratch_operands = 0 : i64, tpu.core_type = #tpu.core_type<tc>, window_params = [{pipeline_mode = #tpu.pipeline_mode<synchronous>, transform_indices = @transform_0, window_bounds = array<i64: 8, 36>}, {pipeline_mode = #tpu.pipeline_mode<synchronous>, transform_indices = @transform_1, window_bounds = array<i64: 36, 512>}, {pipeline_mode = #tpu.pipeline_mode<synchronous>, transform_indices = @transform_2, window_bounds = array<i64: 8, 1>}, {pipeline_mode = #tpu.pipeline_mode<synchronous>, transform_indices = @transform_3, window_bounds = array<i64: 8, 512>}]} {
    %c0 = arith.constant 0 : index
    %c0_0 = arith.constant 0 : index
    %0 = vector.load %arg1[%c0, %c0_0] : memref<8x36xf32, #tpu.memory_space<vmem>>, vector<8x36xf32>
    %c0_1 = arith.constant 0 : index
    %c0_2 = arith.constant 0 : index
    %1 = vector.load %arg2[%c0_1, %c0_2] : memref<36x512xf32, #tpu.memory_space<vmem>>, vector<36x512xf32>
    %cst = arith.constant dense<0.000000e+00> : vector<8x512xf32>
    %2 = tpu.matmul %0, %1, %cst {dimension_numbers = #tpu.dot_dimension_numbers<[1], [0], [0], [1], [0, 0, 1, 1], [], []>} : vector<8x36xf32>, vector<36x512xf32>, vector<8x512xf32> -> vector<8x512xf32>
    %c0_3 = arith.constant 0 : index
    %c0_4 = arith.constant 0 : index
    %3 = vector.load %arg3[%c0_3, %c0_4] : memref<8x1xf32, #tpu.memory_space<vmem>>, vector<8x1xf32>
    %4 = vector.broadcast %3 : vector<8x1xf32> to vector<8x512xf32>
    %5 = arith.addf %2, %4 : vector<8x512xf32>
    %cst_5 = arith.constant 0.000000e+00 : f32
    %6 = vector.broadcast %cst_5 : f32 to vector<8x512xf32>
    %7 = arith.cmpf oge, %5, %6 : vector<8x512xf32>
    %cst_6 = arith.constant 2.000000e-01 : f32
    %8 = vector.broadcast %cst_6 : f32 to vector<8x512xf32>
    %9 = arith.mulf %8, %5 : vector<8x512xf32>
    %10 = arith.select %7, %5, %9 : vector<8x512xi1>, vector<8x512xf32>
    %c0_7 = arith.constant 0 : index
    %c0_8 = arith.constant 0 : index
    %11 = vector.load %arg4[%c0_7, %c0_8] : memref<8x512xf32, #tpu.memory_space<vmem>>, vector<8x512xf32>
    tpu.vector_store %arg4[%c0_7, %c0_8], %10 {strides = array<i32>} : memref<8x512xf32, #tpu.memory_space<vmem>>, vector<8x512xf32>,
    return
  }
  func.func @transform_0(%arg0: i32) -> (i32, i32) {
    %c0_i32 = arith.constant 0 : i32
    %c0_i32_0 = arith.constant 0 : i32
    %c0_i32_1 = arith.constant 0 : i32
    return %c0_i32, %c0_i32_0 : i32, i32
  }
  func.func @transform_1(%arg0: i32) -> (i32, i32) {
    %c0_i32 = arith.constant 0 : i32
    %c0_i32_0 = arith.constant 0 : i32
    %c0_i32_1 = arith.constant 0 : i32
    return %c0_i32, %c0_i32_0 : i32, i32
  }
  func.func @transform_2(%arg0: i32) -> (i32, i32) {
    %c0_i32 = arith.constant 0 : i32
    %c0_i32_0 = arith.constant 0 : i32
    %c0_i32_1 = arith.constant 0 : i32
    return %c0_i32, %c0_i32_0 : i32, i32
  }
  func.func @transform_3(%arg0: i32) -> (i32, i32) {
    %c0_i32 = arith.constant 0 : i32
    %c0_i32_0 = arith.constant 0 : i32
    %c0_i32_1 = arith.constant 0 : i32
    return %c0_i32, %c0_i32_0 : i32, i32
  }
}

module attributes {stable_mosaic.version = 11 : i64} {
  func.func @_fused_conv_bn_lrelu_kernel(%arg0: i32, %arg1: memref<8x72xf32, #tpu.memory_space<vmem>>, %arg2: memref<72x128xf32, #tpu.memory_space<vmem>>, %arg3: memref<8x1xf32, #tpu.memory_space<vmem>>, %arg4: memref<8x128xf32, #tpu.memory_space<vmem>>) attributes {dimension_semantics = [#tpu.dimension_semantics<arbitrary>], iteration_bounds = array<i64: 1>, scalar_prefetch = 0 : i64, scratch_operands = 0 : i64, tpu.core_type = #tpu.core_type<tc>, window_params = [{pipeline_mode = #tpu.pipeline_mode<synchronous>, transform_indices = @transform_0, window_bounds = array<i64: 8, 72>}, {pipeline_mode = #tpu.pipeline_mode<synchronous>, transform_indices = @transform_1, window_bounds = array<i64: 72, 128>}, {pipeline_mode = #tpu.pipeline_mode<synchronous>, transform_indices = @transform_2, window_bounds = array<i64: 8, 1>}, {pipeline_mode = #tpu.pipeline_mode<synchronous>, transform_indices = @transform_3, window_bounds = array<i64: 8, 128>}]} {
    %c0 = arith.constant 0 : index
    %c0_0 = arith.constant 0 : index
    %0 = vector.load %arg1[%c0, %c0_0] : memref<8x72xf32, #tpu.memory_space<vmem>>, vector<8x72xf32>
    %c0_1 = arith.constant 0 : index
    %c0_2 = arith.constant 0 : index
    %1 = vector.load %arg2[%c0_1, %c0_2] : memref<72x128xf32, #tpu.memory_space<vmem>>, vector<72x128xf32>
    %cst = arith.constant dense<0.000000e+00> : vector<8x128xf32>
    %2 = tpu.matmul %0, %1, %cst {dimension_numbers = #tpu.dot_dimension_numbers<[1], [0], [0], [1], [0, 0, 1, 1], [], []>} : vector<8x72xf32>, vector<72x128xf32>, vector<8x128xf32> -> vector<8x128xf32>
    %c0_3 = arith.constant 0 : index
    %c0_4 = arith.constant 0 : index
    %3 = vector.load %arg3[%c0_3, %c0_4] : memref<8x1xf32, #tpu.memory_space<vmem>>, vector<8x1xf32>
    %4 = vector.broadcast %3 : vector<8x1xf32> to vector<8x128xf32>
    %5 = arith.addf %2, %4 : vector<8x128xf32>
    %cst_5 = arith.constant 0.000000e+00 : f32
    %6 = vector.broadcast %cst_5 : f32 to vector<8x128xf32>
    %7 = arith.cmpf oge, %5, %6 : vector<8x128xf32>
    %cst_6 = arith.constant 2.000000e-01 : f32
    %8 = vector.broadcast %cst_6 : f32 to vector<8x128xf32>
    %9 = arith.mulf %8, %5 : vector<8x128xf32>
    %10 = arith.select %7, %5, %9 : vector<8x128xi1>, vector<8x128xf32>
    %c0_7 = arith.constant 0 : index
    %c0_8 = arith.constant 0 : index
    %11 = vector.load %arg4[%c0_7, %c0_8] : memref<8x128xf32, #tpu.memory_space<vmem>>, vector<8x128xf32>
    tpu.vector_store %arg4[%c0_7, %c0_8], %10 {strides = array<i32>} : memref<8x128xf32, #tpu.memory_space<vmem>>, vector<8x128xf32>,
    return
  }
  func.func @transform_0(%arg0: i32) -> (i32, i32) {
    %c0_i32 = arith.constant 0 : i32
    %c0_i32_0 = arith.constant 0 : i32
    %c0_i32_1 = arith.constant 0 : i32
    return %c0_i32, %c0_i32_0 : i32, i32
  }
  func.func @transform_1(%arg0: i32) -> (i32, i32) {
    %c0_i32 = arith.constant 0 : i32
    %c0_i32_0 = arith.constant 0 : i32
    %c0_i32_1 = arith.constant 0 : i32
    return %c0_i32, %c0_i32_0 : i32, i32
  }
  func.func @transform_2(%arg0: i32) -> (i32, i32) {
    %c0_i32 = arith.constant 0 : i32
    %c0_i32_0 = arith.constant 0 : i32
    %c0_i32_1 = arith.constant 0 : i32
    return %c0_i32, %c0_i32_0 : i32, i32
  }
  func.func @transform_3(%arg0: i32) -> (i32, i32) {
    %c0_i32 = arith.constant 0 : i32
    %c0_i32_0 = arith.constant 0 : i32
    %c0_i32_1 = arith.constant 0 : i32
    return %c0_i32, %c0_i32_0 : i32, i32
  }
}

module attributes {stable_mosaic.version = 11 : i64} {
  func.func @_fused_conv_bn_lrelu_kernel(%arg0: i32, %arg1: memref<16x72xf32, #tpu.memory_space<vmem>>, %arg2: memref<72x32xf32, #tpu.memory_space<vmem>>, %arg3: memref<16x1xf32, #tpu.memory_space<vmem>>, %arg4: memref<16x32xf32, #tpu.memory_space<vmem>>) attributes {dimension_semantics = [#tpu.dimension_semantics<arbitrary>], iteration_bounds = array<i64: 1>, scalar_prefetch = 0 : i64, scratch_operands = 0 : i64, tpu.core_type = #tpu.core_type<tc>, window_params = [{pipeline_mode = #tpu.pipeline_mode<synchronous>, transform_indices = @transform_0, window_bounds = array<i64: 16, 72>}, {pipeline_mode = #tpu.pipeline_mode<synchronous>, transform_indices = @transform_1, window_bounds = array<i64: 72, 32>}, {pipeline_mode = #tpu.pipeline_mode<synchronous>, transform_indices = @transform_2, window_bounds = array<i64: 16, 1>}, {pipeline_mode = #tpu.pipeline_mode<synchronous>, transform_indices = @transform_3, window_bounds = array<i64: 16, 32>}]} {
    %c0 = arith.constant 0 : index
    %c0_0 = arith.constant 0 : index
    %0 = vector.load %arg1[%c0, %c0_0] : memref<16x72xf32, #tpu.memory_space<vmem>>, vector<16x72xf32>
    %c0_1 = arith.constant 0 : index
    %c0_2 = arith.constant 0 : index
    %1 = vector.load %arg2[%c0_1, %c0_2] : memref<72x32xf32, #tpu.memory_space<vmem>>, vector<72x32xf32>
    %cst = arith.constant dense<0.000000e+00> : vector<16x32xf32>
    %2 = tpu.matmul %0, %1, %cst {dimension_numbers = #tpu.dot_dimension_numbers<[1], [0], [0], [1], [0, 0, 1, 1], [], []>} : vector<16x72xf32>, vector<72x32xf32>, vector<16x32xf32> -> vector<16x32xf32>
    %c0_3 = arith.constant 0 : index
    %c0_4 = arith.constant 0 : index
    %3 = vector.load %arg3[%c0_3, %c0_4] : memref<16x1xf32, #tpu.memory_space<vmem>>, vector<16x1xf32>
    %4 = vector.broadcast %3 : vector<16x1xf32> to vector<16x32xf32>
    %5 = arith.addf %2, %4 : vector<16x32xf32>
    %cst_5 = arith.constant 0.000000e+00 : f32
    %6 = vector.broadcast %cst_5 : f32 to vector<16x32xf32>
    %7 = arith.cmpf oge, %5, %6 : vector<16x32xf32>
    %cst_6 = arith.constant 2.000000e-01 : f32
    %8 = vector.broadcast %cst_6 : f32 to vector<16x32xf32>
    %9 = arith.mulf %8, %5 : vector<16x32xf32>
    %10 = arith.select %7, %5, %9 : vector<16x32xi1>, vector<16x32xf32>
    %c0_7 = arith.constant 0 : index
    %c0_8 = arith.constant 0 : index
    %11 = vector.load %arg4[%c0_7, %c0_8] : memref<16x32xf32, #tpu.memory_space<vmem>>, vector<16x32xf32>
    tpu.vector_store %arg4[%c0_7, %c0_8], %10 {strides = array<i32>} : memref<16x32xf32, #tpu.memory_space<vmem>>, vector<16x32xf32>,
    return
  }
  func.func @transform_0(%arg0: i32) -> (i32, i32) {
    %c0_i32 = arith.constant 0 : i32
    %c0_i32_0 = arith.constant 0 : i32
    %c0_i32_1 = arith.constant 0 : i32
    return %c0_i32, %c0_i32_0 : i32, i32
  }
  func.func @transform_1(%arg0: i32) -> (i32, i32) {
    %c0_i32 = arith.constant 0 : i32
    %c0_i32_0 = arith.constant 0 : i32
    %c0_i32_1 = arith.constant 0 : i32
    return %c0_i32, %c0_i32_0 : i32, i32
  }
  func.func @transform_2(%arg0: i32) -> (i32, i32) {
    %c0_i32 = arith.constant 0 : i32
    %c0_i32_0 = arith.constant 0 : i32
    %c0_i32_1 = arith.constant 0 : i32
    return %c0_i32, %c0_i32_0 : i32, i32
  }
  func.func @transform_3(%arg0: i32) -> (i32, i32) {
    %c0_i32 = arith.constant 0 : i32
    %c0_i32_0 = arith.constant 0 : i32
    %c0_i32_1 = arith.constant 0 : i32
    return %c0_i32, %c0_i32_0 : i32, i32
  }
}

module attributes {stable_mosaic.version = 11 : i64} {
  func.func @_fused_conv_bn_lrelu_kernel(%arg0: i32, %arg1: memref<16x144xf32, #tpu.memory_space<vmem>>, %arg2: memref<144x8xf32, #tpu.memory_space<vmem>>, %arg3: memref<16x1xf32, #tpu.memory_space<vmem>>, %arg4: memref<16x8xf32, #tpu.memory_space<vmem>>) attributes {dimension_semantics = [#tpu.dimension_semantics<arbitrary>], iteration_bounds = array<i64: 1>, scalar_prefetch = 0 : i64, scratch_operands = 0 : i64, tpu.core_type = #tpu.core_type<tc>, window_params = [{pipeline_mode = #tpu.pipeline_mode<synchronous>, transform_indices = @transform_0, window_bounds = array<i64: 16, 144>}, {pipeline_mode = #tpu.pipeline_mode<synchronous>, transform_indices = @transform_1, window_bounds = array<i64: 144, 8>}, {pipeline_mode = #tpu.pipeline_mode<synchronous>, transform_indices = @transform_2, window_bounds = array<i64: 16, 1>}, {pipeline_mode = #tpu.pipeline_mode<synchronous>, transform_indices = @transform_3, window_bounds = array<i64: 16, 8>}]} {
    %c0 = arith.constant 0 : index
    %c0_0 = arith.constant 0 : index
    %0 = vector.load %arg1[%c0, %c0_0] : memref<16x144xf32, #tpu.memory_space<vmem>>, vector<16x144xf32>
    %c0_1 = arith.constant 0 : index
    %c0_2 = arith.constant 0 : index
    %1 = vector.load %arg2[%c0_1, %c0_2] : memref<144x8xf32, #tpu.memory_space<vmem>>, vector<144x8xf32>
    %cst = arith.constant dense<0.000000e+00> : vector<16x8xf32>
    %2 = tpu.matmul %0, %1, %cst {dimension_numbers = #tpu.dot_dimension_numbers<[1], [0], [0], [1], [0, 0, 1, 1], [], []>} : vector<16x144xf32>, vector<144x8xf32>, vector<16x8xf32> -> vector<16x8xf32>
    %c0_3 = arith.constant 0 : index
    %c0_4 = arith.constant 0 : index
    %3 = vector.load %arg3[%c0_3, %c0_4] : memref<16x1xf32, #tpu.memory_space<vmem>>, vector<16x1xf32>
    %4 = vector.broadcast %3 : vector<16x1xf32> to vector<16x8xf32>
    %5 = arith.addf %2, %4 : vector<16x8xf32>
    %cst_5 = arith.constant 0.000000e+00 : f32
    %6 = vector.broadcast %cst_5 : f32 to vector<16x8xf32>
    %7 = arith.cmpf oge, %5, %6 : vector<16x8xf32>
    %cst_6 = arith.constant 2.000000e-01 : f32
    %8 = vector.broadcast %cst_6 : f32 to vector<16x8xf32>
    %9 = arith.mulf %8, %5 : vector<16x8xf32>
    %10 = arith.select %7, %5, %9 : vector<16x8xi1>, vector<16x8xf32>
    %c0_7 = arith.constant 0 : index
    %c0_8 = arith.constant 0 : index
    %11 = vector.load %arg4[%c0_7, %c0_8] : memref<16x8xf32, #tpu.memory_space<vmem>>, vector<16x8xf32>
    tpu.vector_store %arg4[%c0_7, %c0_8], %10 {strides = array<i32>} : memref<16x8xf32, #tpu.memory_space<vmem>>, vector<16x8xf32>,
    return
  }
  func.func @transform_0(%arg0: i32) -> (i32, i32) {
    %c0_i32 = arith.constant 0 : i32
    %c0_i32_0 = arith.constant 0 : i32
    %c0_i32_1 = arith.constant 0 : i32
    return %c0_i32, %c0_i32_0 : i32, i32
  }
  func.func @transform_1(%arg0: i32) -> (i32, i32) {
    %c0_i32 = arith.constant 0 : i32
    %c0_i32_0 = arith.constant 0 : i32
    %c0_i32_1 = arith.constant 0 : i32
    return %c0_i32, %c0_i32_0 : i32, i32
  }
  func.func @transform_2(%arg0: i32) -> (i32, i32) {
    %c0_i32 = arith.constant 0 : i32
    %c0_i32_0 = arith.constant 0 : i32
    %c0_i32_1 = arith.constant 0 : i32
    return %c0_i32, %c0_i32_0 : i32, i32
  }
  func.func @transform_3(%arg0: i32) -> (i32, i32) {
    %c0_i32 = arith.constant 0 : i32
    %c0_i32_0 = arith.constant 0 : i32
    %c0_i32_1 = arith.constant 0 : i32
    return %c0_i32, %c0_i32_0 : i32, i32
  }
}

module attributes {stable_mosaic.version = 11 : i64} {
  func.func @_fused_conv_bn_lrelu_kernel(%arg0: i32, %arg1: memref<8x144xf32, #tpu.memory_space<vmem>>, %arg2: memref<144x8xf32, #tpu.memory_space<vmem>>, %arg3: memref<8x1xf32, #tpu.memory_space<vmem>>, %arg4: memref<8x8xf32, #tpu.memory_space<vmem>>) attributes {dimension_semantics = [#tpu.dimension_semantics<arbitrary>], iteration_bounds = array<i64: 1>, scalar_prefetch = 0 : i64, scratch_operands = 0 : i64, tpu.core_type = #tpu.core_type<tc>, window_params = [{pipeline_mode = #tpu.pipeline_mode<synchronous>, transform_indices = @transform_0, window_bounds = array<i64: 8, 144>}, {pipeline_mode = #tpu.pipeline_mode<synchronous>, transform_indices = @transform_1, window_bounds = array<i64: 144, 8>}, {pipeline_mode = #tpu.pipeline_mode<synchronous>, transform_indices = @transform_2, window_bounds = array<i64: 8, 1>}, {pipeline_mode = #tpu.pipeline_mode<synchronous>, transform_indices = @transform_3, window_bounds = array<i64: 8, 8>}]} {
    %c0 = arith.constant 0 : index
    %c0_0 = arith.constant 0 : index
    %0 = vector.load %arg1[%c0, %c0_0] : memref<8x144xf32, #tpu.memory_space<vmem>>, vector<8x144xf32>
    %c0_1 = arith.constant 0 : index
    %c0_2 = arith.constant 0 : index
    %1 = vector.load %arg2[%c0_1, %c0_2] : memref<144x8xf32, #tpu.memory_space<vmem>>, vector<144x8xf32>
    %cst = arith.constant dense<0.000000e+00> : vector<8x8xf32>
    %2 = tpu.matmul %0, %1, %cst {dimension_numbers = #tpu.dot_dimension_numbers<[1], [0], [0], [1], [0, 0, 1, 1], [], []>} : vector<8x144xf32>, vector<144x8xf32>, vector<8x8xf32> -> vector<8x8xf32>
    %c0_3 = arith.constant 0 : index
    %c0_4 = arith.constant 0 : index
    %3 = vector.load %arg3[%c0_3, %c0_4] : memref<8x1xf32, #tpu.memory_space<vmem>>, vector<8x1xf32>
    %4 = vector.broadcast %3 : vector<8x1xf32> to vector<8x8xf32>
    %5 = arith.addf %2, %4 : vector<8x8xf32>
    %cst_5 = arith.constant 0.000000e+00 : f32
    %6 = vector.broadcast %cst_5 : f32 to vector<8x8xf32>
    %7 = arith.cmpf oge, %5, %6 : vector<8x8xf32>
    %cst_6 = arith.constant 2.000000e-01 : f32
    %8 = vector.broadcast %cst_6 : f32 to vector<8x8xf32>
    %9 = arith.mulf %8, %5 : vector<8x8xf32>
    %10 = arith.select %7, %5, %9 : vector<8x8xi1>, vector<8x8xf32>
    %c0_7 = arith.constant 0 : index
    %c0_8 = arith.constant 0 : index
    %11 = vector.load %arg4[%c0_7, %c0_8] : memref<8x8xf32, #tpu.memory_space<vmem>>, vector<8x8xf32>
    tpu.vector_store %arg4[%c0_7, %c0_8], %10 {strides = array<i32>} : memref<8x8xf32, #tpu.memory_space<vmem>>, vector<8x8xf32>,
    return
  }
  func.func @transform_0(%arg0: i32) -> (i32, i32) {
    %c0_i32 = arith.constant 0 : i32
    %c0_i32_0 = arith.constant 0 : i32
    %c0_i32_1 = arith.constant 0 : i32
    return %c0_i32, %c0_i32_0 : i32, i32
  }
  func.func @transform_1(%arg0: i32) -> (i32, i32) {
    %c0_i32 = arith.constant 0 : i32
    %c0_i32_0 = arith.constant 0 : i32
    %c0_i32_1 = arith.constant 0 : i32
    return %c0_i32, %c0_i32_0 : i32, i32
  }
  func.func @transform_2(%arg0: i32) -> (i32, i32) {
    %c0_i32 = arith.constant 0 : i32
    %c0_i32_0 = arith.constant 0 : i32
    %c0_i32_1 = arith.constant 0 : i32
    return %c0_i32, %c0_i32_0 : i32, i32
  }
  func.func @transform_3(%arg0: i32) -> (i32, i32) {
    %c0_i32 = arith.constant 0 : i32
    %c0_i32_0 = arith.constant 0 : i32
    %c0_i32_1 = arith.constant 0 : i32
    return %c0_i32, %c0_i32_0 : i32, i32
  }
}

</mosaic_0001>

<bundles_post_ra>
// kernel: classifier_forward.6
= control target key start
LH: loop header
LB: loop body
LE: loop exit
PB: predicated region body
PF: predicated region fallthrough
CT: control target
= control target key end

     0   :  { %vm57_vm0 = vcmask 1040384   ;;  %v793_v3 = vmov 0.0   ;;  %vm53_vm1 = vcmask 72704   ;;  %v794_v35 = vmov 0   ;;  %s1001_s1 = inlined_call_operand.vmem [shape: f32[9,2048], index: 1, kind: input, shape index: {}]   ;;  %s1002_s0 = inlined_call_operand.vmem [shape: f32[4,9], index: 0, kind: input, shape index: {}]   ;;  %s1003_s2 = inlined_call_operand.vmem [shape: f32[4,1], index: 2, kind: input, shape index: {}]   ;;  %s1004_s3 = inlined_call_operand.vmem [shape: f32[4,2048], index: 3, kind: output, shape index: {}]  }
   0x1   :  { %v32_v0 = vld [vmem:[%s1001_s1 + $0x88] sm:$0x1]  ;;  %v34_v1 = vld [vmem:[%s1001_s1 + $0x98] sm:$0x1]  ;;  %v31_v2 = vld [vmem:[%s1001_s1 + $0x80] sm:$0x1]  ;;  %170 = vmatprep.mubr.f32.mxu0 %v793_v3  ;;  %241 = vmatprep.mubr.f32.mxu1 %v793_v3 }
   0x2   :  { %766 = vmatprep.subr.msk.mxu0 %vm57_vm0, %v32_v0  ;;  %769 = vmatprep.subr.msk.mxu1 %vm57_vm0, %v34_v1  ;;  %v33_v4 = vld [vmem:[%s1001_s1 + $0x90] sm:$0x1]  ;;  %v16_v5 = vld [vmem:[%s1001_s1 + $0x8] sm:$0xff]  ;;  %v18_v6 = vld [vmem:[%s1001_s1 + $0x18] sm:$0xff] }
   0x3   :  { %767 = vmatpush1.msk.msra.mxu0 %vm57_vm0, %v31_v2  ;;  %770 = vmatpush1.msk.msra.mxu1 %vm57_vm0, %v33_v4  ;;  %v15_v7 = vld [vmem:[%s1001_s1] sm:$0xff]  ;;  %v17_v8 = vld [vmem:[%s1001_s1 + $0x10] sm:$0xff]  ;;  %v36_v10 = vld [vmem:[%s1001_s1 + $0xa8] sm:$0x1] }
   0x4   :  { %v848_v9 = vld [vmem:[%s1002_s0] sm:$0xf]  ;;  %136 = vmatprep.subr.mxu0 %v16_v5  ;;  %207 = vmatprep.subr.mxu1 %v18_v6  ;;  %v38_v11 = vld [vmem:[%s1001_s1 + $0xb8] sm:$0x1]  ;;  %v37_v13 = vld [vmem:[%s1001_s1 + $0xb0] sm:$0x1] }
   0x5   :  { %137 = vmatpush1.msra.mxu0 %v15_v7  ;;  %208 = vmatpush1.msra.mxu1 %v17_v8  ;;  %v35_v12 = vld [vmem:[%s1001_s1 + $0xa0] sm:$0x1]  ;;  %v20_v14 = vld [vmem:[%s1001_s1 + $0x28] sm:$0xff]  ;;  %v22_v15 = vld [vmem:[%s1001_s1 + $0x38] sm:$0xff] }
   0x6   :  { %768 = vmatmul.mubr.msk.f32.vlgmr.msra.gmra.mxu0 %vm53_vm1, %v848_v9  ;;  %771 = vmatmul.mubr.msk.f32.vlgmr.msra.gmra.mxu1 %vm53_vm1, %v848_v9  ;;  %v19_v16 = vld [vmem:[%s1001_s1 + $0x20] sm:$0xff]  ;;  %v21_v17 = vld [vmem:[%s1001_s1 + $0x30] sm:$0xff]  ;;  %v40_v18 = vld [vmem:[%s1001_s1 + $0xc8] sm:$0x1] }
   0x7   :  { %772 = vmatprep.subr.msk.mxu0 %vm57_vm0, %v36_v10  ;;  %775 = vmatprep.subr.msk.mxu1 %vm57_vm0, %v38_v11  ;;  %v42_v19 = vld [vmem:[%s1001_s1 + $0xd8] sm:$0x1]  ;;  %v39_v20 = vld [vmem:[%s1001_s1 + $0xc0] sm:$0x1]  ;;  %v41_v21 = vld [vmem:[%s1001_s1 + $0xd0] sm:$0x1] }
   0x8   :  { %773 = vmatpush1.msk.msra.mxu0 %vm57_vm0, %v35_v12  ;;  %776 = vmatpush1.msk.msra.mxu1 %vm57_vm0, %v37_v13  ;;  %v24_v22 = vld [vmem:[%s1001_s1 + $0x48] sm:$0xff]  ;;  %v26_v23 = vld [vmem:[%s1001_s1 + $0x58] sm:$0xff]  ;;  %v23_v24 = vld [vmem:[%s1001_s1 + $0x40] sm:$0xff] }
   0x9   :  { %278 = vmatprep.subr.mxu0 %v20_v14  ;;  %349 = vmatprep.subr.mxu1 %v22_v15  ;;  %v25_v25 = vld [vmem:[%s1001_s1 + $0x50] sm:$0xff]  ;;  %v44_v26 = vld [vmem:[%s1001_s1 + $0xe8] sm:$0x1]  ;;  %v46_v27 = vld [vmem:[%s1001_s1 + $0xf8] sm:$0x1] }
   0xa   :  { %279 = vmatpush1.msra.mxu0 %v19_v16  ;;  %312 = vmatprep.mubr.f32.mxu0 %v793_v3  ;;  %v43_v28 = vld [vmem:[%s1001_s1 + $0xe0] sm:$0x1]  ;;  %v45_v29 = vld [vmem:[%s1001_s1 + $0xf0] sm:$0x1]  ;;  %v28_v30 = vld [vmem:[%s1001_s1 + $0x68] sm:$0xff] }
   0xb   :  { %350 = vmatpush1.msra.mxu1 %v21_v17  ;;  %383 = vmatprep.mubr.f32.mxu1 %v793_v3  ;;  %v30_v31 = vld [vmem:[%s1001_s1 + $0x78] sm:$0xff]  ;;  %v27_v32 = vld [vmem:[%s1001_s1 + $0x60] sm:$0xff]  ;;  %v29_v33 = vld [vmem:[%s1001_s1 + $0x70] sm:$0xff] }
   0xc   :  { %774 = vmatmul.mubr.msk.f32.vlgmr.msra.gmra.mxu0 %vm53_vm1, %v848_v9  ;;  %777 = vmatmul.mubr.msk.f32.vlgmr.msra.gmra.mxu1 %vm53_vm1, %v848_v9  ;;  %v47_v34 = vld [vmem:[%s1003_s2] sm:$0xf] }
   0xd   :  { %778 = vmatprep.subr.msk.mxu0 %vm57_vm0, %v40_v18  ;;  %781 = vmatprep.subr.msk.mxu1 %vm57_vm0, %v42_v19 }
   0xe   :  { %779 = vmatpush1.msk.msra.mxu0 %vm57_vm0, %v39_v20  ;;  %782 = vmatpush1.msk.msra.mxu1 %vm57_vm0, %v41_v21 }
   0xf   :  { %420 = vmatprep.subr.mxu0 %v24_v22  ;;  %491 = vmatprep.subr.mxu1 %v26_v23 }
  0x10   :  { %421 = vmatpush1.msra.mxu0 %v23_v24  ;;  %454 = vmatprep.mubr.f32.mxu0 %v793_v3 }
  0x11   :  { %492 = vmatpush1.msra.mxu1 %v25_v25  ;;  %525 = vmatprep.mubr.f32.mxu1 %v793_v3 }
  0x12   :  { %780 = vmatmul.mubr.msk.f32.vlgmr.msra.gmra.mxu0 %vm53_vm1, %v848_v9  ;;  %783 = vmatmul.mubr.msk.f32.vlgmr.msra.gmra.mxu1 %vm53_vm1, %v848_v9 }
  0x13   :  { %784 = vmatprep.subr.msk.mxu0 %vm57_vm0, %v44_v26  ;;  %787 = vmatprep.subr.msk.mxu1 %vm57_vm0, %v46_v27 }
  0x14   :  { %785 = vmatpush1.msk.msra.mxu0 %vm57_vm0, %v43_v28  ;;  %788 = vmatpush1.msk.msra.mxu1 %vm57_vm0, %v45_v29 }
  0x15   :  { %562 = vmatprep.subr.mxu0 %v28_v30  ;;  %633 = vmatprep.subr.mxu1 %v30_v31 }
  0x16   :  { %563 = vmatpush1.msra.mxu0 %v27_v32  ;;  %596 = vmatprep.mubr.f32.mxu0 %v793_v3 }
  0x17   :  { %634 = vmatpush1.msra.mxu1 %v29_v33  ;;  %667 = vmatprep.mubr.f32.mxu1 %v793_v3 }
  0x18   :  { %786 = vmatmul.mubr.msk.f32.vlgmr.msra.gmra.mxu0 %vm53_vm1, %v848_v9  ;;  %789 = vmatmul.mubr.msk.f32.vlgmr.msra.gmra.mxu1 %vm53_vm1, %v848_v9 }
  0x19   :  { %792 = vset.pattern.permute.xlu0 %v794_v35 }
  0x1a   :  { %50 = vperm.xlu0 %792, %v47_v34  }
  0x95   :  { %v959_v36 = vpop.permute.xlu0 %50 }
  0xc6   :  { %v172_v37 = vpop.f32.mrf.mxu0  ;;  %v243_v38 = vpop.f32.mrf.mxu1 }
  0xc7   :  { %v173_v39 = vadd.f32 %v172_v37, %v959_v36  ;;  %v244_v40 = vadd.f32 %v243_v38, %v959_v36 }
  0xc8   :  { %v174_v41 = vpop.f32.mrf.mxu0  ;;  %v245_v42 = vpop.f32.mrf.mxu1 }
  0xc9   :  { %v690_v43 = vmul.f32 0.2, %v173_v39  ;;  %v692_v44 = vmul.f32 0.2, %v244_v40  ;;  %v175_v45 = vadd.f32 %v174_v41, %v959_v36  ;;  %v246_v46 = vadd.f32 %v245_v42, %v959_v36 }
  0xca   :  { %vm674_vm2 = vcmp.ge.f32.partialorder %v173_v39, 0.0  ;;  %vm676_vm3 = vcmp.ge.f32.partialorder %v244_v40, 0.0 }
  0xcb   :  { %vm675_vm4 = vcmp.ge.f32.partialorder %v175_v45, 0.0  ;;  %v691_v47 = vmul.f32 0.2, %v175_v45  ;;  %vm677_vm5 = vcmp.ge.f32.partialorder %v246_v46, 0.0  ;;  %v693_v48 = vmul.f32 0.2, %v246_v46 }
  0xcc   :  { %v314_v49 = vpop.f32.mrf.mxu0  ;;  %v385_v50 = vpop.f32.mrf.mxu1  ;;  %v706_v53 = vsel %vm674_vm2, %v173_v39, %v690_v43  ;;  %v708_v54 = vsel %vm676_vm3, %v244_v40, %v692_v44 }
  0xcd   :  { %v315_v51 = vadd.f32 %v314_v49, %v959_v36  ;;  %v386_v52 = vadd.f32 %v385_v50, %v959_v36  ;;  %v707_v55 = vsel %vm675_vm4, %v175_v45, %v691_v47  ;;  %v709_v56 = vsel %vm677_vm5, %v246_v46, %v693_v48 }
  0xce   :  { %v316_v57 = vpop.f32.mrf.mxu0  ;;  %v387_v58 = vpop.f32.mrf.mxu1  ;;  %v738_v59 = vcombine.low %v706_v53, %v707_v55  ;;  %v739_v60 = vcombine.low %v708_v54, %v709_v56 }
  0xcf   :  { %v694_v61 = vmul.f32 0.2, %v315_v51  ;;  %v317_v62 = vadd.f32 %v316_v57, %v959_v36  ;;  %v388_v63 = vadd.f32 %v387_v58, %v959_v36  ;;  %vm678_vm6 = vcmp.ge.f32.partialorder %v315_v51, 0.0 }
  0xd0   :  { %754 = vst [vmem:[%s1004_s3] sm:$0xff] %v738_v59  ;;  %755 = vst [vmem:[%s1004_s3 + $0x8] sm:$0xff] %v739_v60  ;;  %v696_v0 = vmul.f32 0.2, %v386_v52  ;;  %vm680_vm7 = vcmp.ge.f32.partialorder %v386_v52, 0.0 }
  0xd1   :  { %vm679_vm8 = vcmp.ge.f32.partialorder %v317_v62, 0.0  ;;  %v695_v1 = vmul.f32 0.2, %v317_v62  ;;  %vm681_vm9 = vcmp.ge.f32.partialorder %v388_v63, 0.0  ;;  %v697_v4 = vmul.f32 0.2, %v388_v63 }
  0xd2   :  { %v456_v2 = vpop.f32.mrf.mxu0  ;;  %v527_v3 = vpop.f32.mrf.mxu1  ;;  %v710_v7 = vsel %vm678_vm6, %v315_v51, %v694_v61  ;;  %v712_v11 = vsel %vm680_vm7, %v386_v52, %v696_v0 }
  0xd3   :  { %v457_v5 = vadd.f32 %v456_v2, %v959_v36  ;;  %v528_v6 = vadd.f32 %v527_v3, %v959_v36  ;;  %v711_v8 = vsel %vm679_vm8, %v317_v62, %v695_v1  ;;  %v713_v13 = vsel %vm681_vm9, %v388_v63, %v697_v4 }
  0xd4   :  { %v458_v9 = vpop.f32.mrf.mxu0  ;;  %v529_v10 = vpop.f32.mrf.mxu1  ;;  %v740_v12 = vcombine.low %v710_v7, %v711_v8  ;;  %v741_v14 = vcombine.low %v712_v11, %v713_v13 }
  0xd5   :  { %v698_v15 = vmul.f32 0.2, %v457_v5  ;;  %v459_v16 = vadd.f32 %v458_v9, %v959_v36  ;;  %vm682_vm10 = vcmp.ge.f32.partialorder %v457_v5, 0.0  ;;  %v700_v17 = vmul.f32 0.2, %v528_v6 }
  0xd6   :  { %756 = vst [vmem:[%s1004_s3 + $0x10] sm:$0xff] %v740_v12  ;;  %v530_v18 = vadd.f32 %v529_v10, %v959_v36  ;;  %757 = vst [vmem:[%s1004_s3 + $0x18] sm:$0xff] %v741_v14  ;;  %vm684_vm11 = vcmp.ge.f32.partialorder %v528_v6, 0.0 }
  0xd7   :  { %vm683_vm12 = vcmp.ge.f32.partialorder %v459_v16, 0.0  ;;  %v699_v19 = vmul.f32 0.2, %v459_v16  ;;  %v714_v25 = vsel %vm682_vm10, %v457_v5, %v698_v15  ;;  %v716_v29 = vsel %vm684_vm11, %v528_v6, %v700_v17 }
  0xd8   :  { %v598_v20 = vpop.f32.mrf.mxu0  ;;  %v669_v21 = vpop.f32.mrf.mxu1  ;;  %vm685_vm13 = vcmp.ge.f32.partialorder %v530_v18, 0.0  ;;  %v701_v22 = vmul.f32 0.2, %v530_v18 }
  0xd9   :  { %v599_v23 = vadd.f32 %v598_v20, %v959_v36  ;;  %v670_v24 = vadd.f32 %v669_v21, %v959_v36  ;;  %v715_v26 = vsel %vm683_vm12, %v459_v16, %v699_v19 }
  0xda   :  { %v600_v27 = vpop.f32.mrf.mxu0  ;;  %v671_v28 = vpop.f32.mrf.mxu1  ;;  %v742_v30 = vcombine.low %v714_v25, %v715_v26  ;;  %v717_v31 = vsel %vm685_vm13, %v530_v18, %v701_v22 }
  0xdb   :  { %v743_v32 = vcombine.low %v716_v29, %v717_v31  ;;  %v702_v33 = vmul.f32 0.2, %v599_v23  ;;  %v601_v34 = vadd.f32 %v600_v27, %v959_v36  ;;  %vm686_vm14 = vcmp.ge.f32.partialorder %v599_v23, 0.0 }
  0xdc   :  { %758 = vst [vmem:[%s1004_s3 + $0x20] sm:$0xff] %v742_v30  ;;  %v704_v35 = vmul.f32 0.2, %v670_v24  ;;  %v672_v37 = vadd.f32 %v671_v28, %v959_v36  ;;  %vm688_vm15 = vcmp.ge.f32.partialorder %v670_v24, 0.0 }
  0xdd   :  { %759 = vst [vmem:[%s1004_s3 + $0x28] sm:$0xff] %v743_v32  ;;  %vm687_vm0 = vcmp.ge.f32.partialorder %v601_v34, 0.0  ;;  %v703_v38 = vmul.f32 0.2, %v601_v34  ;;  %v718_v40 = vsel %vm686_vm14, %v599_v23, %v702_v33 }
  0xde   :  { %vm689_vm1 = vcmp.ge.f32.partialorder %v672_v37, 0.0  ;;  %v705_v39 = vmul.f32 0.2, %v672_v37  ;;  %v720_v42 = vsel %vm688_vm15, %v670_v24, %v704_v35 }
  0xdf   :  { %v719_v41 = vsel %vm687_vm0, %v601_v34, %v703_v38 }
  0xe0   :  { %v744_v43 = vcombine.low %v718_v40, %v719_v41  ;;  %v721_v44 = vsel %vm689_vm1, %v672_v37, %v705_v39 }
  0xe1   :  { %v745_v45 = vcombine.low %v720_v42, %v721_v44 }
  0xe2   :  { %760 = vst [vmem:[%s1004_s3 + $0x30] sm:$0xff] %v744_v43 }
  0xe3   :  { %761 = vst [vmem:[%s1004_s3 + $0x38] sm:$0xff] %v745_v45 }

// kernel: classifier_forward.7
= control target key start
LH: loop header
LB: loop body
LE: loop exit
PB: predicated region body
PF: predicated region fallthrough
CT: control target
= control target key end

     0   :  { %vm45_vm0 = vcmask 1043456   ;;  %v229_v3 = vmov 0.0   ;;  %vm41_vm1 = vcmask 293888   ;;  %v230_v23 = vmov 0   ;;  %s329_s1 = inlined_call_operand.vmem [shape: f32[36,512], index: 1, kind: input, shape index: {}]   ;;  %s330_s0 = inlined_call_operand.vmem [shape: f32[8,36], index: 0, kind: input, shape index: {}]   ;;  %s331_s2 = inlined_call_operand.vmem [shape: f32[8,1], index: 2, kind: input, shape index: {}]   ;;  %s332_s3 = inlined_call_operand.vmem [shape: f32[8,512], index: 3, kind: output, shape index: {}]  }
   0x1   :  { %v32_v0 = vld [vmem:[%s329_s1 + $0x88] sm:$0xf]  ;;  %v34_v1 = vld [vmem:[%s329_s1 + $0x98] sm:$0xf]  ;;  %v31_v2 = vld [vmem:[%s329_s1 + $0x80] sm:$0xf]  ;;  %122 = vmatprep.mubr.f32.mxu0 %v229_v3  ;;  %193 = vmatprep.mubr.f32.mxu1 %v229_v3 }
   0x2   :  { %220 = vmatprep.subr.msk.mxu0 %vm45_vm0, %v32_v0  ;;  %223 = vmatprep.subr.msk.mxu1 %vm45_vm0, %v34_v1  ;;  %v33_v4 = vld [vmem:[%s329_s1 + $0x90] sm:$0xf]  ;;  %v28_v5 = vld [vmem:[%s329_s1 + $0x68] sm:$0xff]  ;;  %v30_v6 = vld [vmem:[%s329_s1 + $0x78] sm:$0xff] }
   0x3   :  { %221 = vmatpush1.msk.msra.mxu0 %vm45_vm0, %v31_v2  ;;  %224 = vmatpush1.msk.msra.mxu1 %vm45_vm0, %v33_v4  ;;  %v27_v7 = vld [vmem:[%s329_s1 + $0x60] sm:$0xff]  ;;  %v29_v8 = vld [vmem:[%s329_s1 + $0x70] sm:$0xff]  ;;  %v24_v9 = vld [vmem:[%s329_s1 + $0x48] sm:$0xff] }
   0x4   :  { %82 = vmatprep.subr.mxu0 %v28_v5  ;;  %153 = vmatprep.subr.mxu1 %v30_v6  ;;  %v26_v10 = vld [vmem:[%s329_s1 + $0x58] sm:$0xff]  ;;  %v23_v11 = vld [vmem:[%s329_s1 + $0x40] sm:$0xff]  ;;  %v25_v12 = vld [vmem:[%s329_s1 + $0x50] sm:$0xff] }
   0x5   :  { %83 = vmatpush1.msra.mxu0 %v27_v7  ;;  %154 = vmatpush1.msra.mxu1 %v29_v8  ;;  %v20_v13 = vld [vmem:[%s329_s1 + $0x28] sm:$0xff]  ;;  %v22_v14 = vld [vmem:[%s329_s1 + $0x38] sm:$0xff]  ;;  %v19_v15 = vld [vmem:[%s329_s1 + $0x20] sm:$0xff] }
   0x6   :  { %84 = vmatprep.subr.mxu0 %v24_v9  ;;  %155 = vmatprep.subr.mxu1 %v26_v10  ;;  %v21_v16 = vld [vmem:[%s329_s1 + $0x30] sm:$0xff]  ;;  %v16_v17 = vld [vmem:[%s329_s1 + $0x8] sm:$0xff]  ;;  %v18_v18 = vld [vmem:[%s329_s1 + $0x18] sm:$0xff] }
   0x7   :  { %85 = vmatpush1.msra.mxu0 %v23_v11  ;;  %156 = vmatpush1.msra.mxu1 %v25_v12  ;;  %v15_v19 = vld [vmem:[%s329_s1] sm:$0xff]  ;;  %v17_v20 = vld [vmem:[%s329_s1 + $0x10] sm:$0xff] }
   0x8   :  { %86 = vmatprep.subr.mxu0 %v20_v13  ;;  %157 = vmatprep.subr.mxu1 %v22_v14  ;;  %v14_v21 = vld [vmem:[%s330_s0] sm:$0xff] }
   0x9   :  { %87 = vmatpush1.msra.mxu0 %v19_v15  ;;  %158 = vmatpush1.msra.mxu1 %v21_v16  ;;  %v35_v22 = vld [vmem:[%s331_s2] sm:$0xff] }
   0xa   :  { %88 = vmatprep.subr.mxu0 %v16_v17  ;;  %159 = vmatprep.subr.mxu1 %v18_v18 }
   0xb   :  { %89 = vmatpush1.msra.mxu0 %v15_v19  ;;  %160 = vmatpush1.msra.mxu1 %v17_v20 }
   0xc   :  { %222 = vmatmul.mubr.msk.f32.vlgmr.msra.gmra.mxu0 %vm41_vm1, %v14_v21  ;;  %225 = vmatmul.mubr.msk.f32.vlgmr.msra.gmra.mxu1 %vm41_vm1, %v14_v21 }
   0xd   :  { %228 = vset.pattern.permute.xlu0 %v230_v23 }
   0xe   :  { %38 = vperm.xlu0 %228, %v35_v22  }
  0x89   :  { %v39_v24 = vpop.permute.xlu0 %38 }
  0xcc   :  { %v124_v25 = vpop.f32.mrf.mxu0  ;;  %v195_v26 = vpop.f32.mrf.mxu1 }
  0xcd   :  { %v125_v27 = vadd.f32 %v124_v25, %v39_v24  ;;  %v196_v28 = vadd.f32 %v195_v26, %v39_v24 }
  0xce   :  { %v126_v29 = vpop.f32.mrf.mxu0  ;;  %v197_v30 = vpop.f32.mrf.mxu1 }
  0xcf   :  { %vm200_vm2 = vcmp.ge.f32.partialorder %v125_v27, 0.0  ;;  %v204_v31 = vmul.f32 0.2, %v125_v27  ;;  %vm202_vm3 = vcmp.ge.f32.partialorder %v196_v28, 0.0  ;;  %v206_v32 = vmul.f32 0.2, %v196_v28 }
  0xd0   :  { %v127_v33 = vadd.f32 %v126_v29, %v39_v24  ;;  %v198_v34 = vadd.f32 %v197_v30, %v39_v24 }
  0xd1   :  { %v208_v35 = vsel %vm200_vm2, %v125_v27, %v204_v31  ;;  %v210_v36 = vsel %vm202_vm3, %v196_v28, %v206_v32 }
  0xd2   :  { %212 = vst [vmem:[%s332_s3] sm:$0xff] %v208_v35  ;;  %214 = vst [vmem:[%s332_s3 + $0x10] sm:$0xff] %v210_v36  ;;  %vm201_vm4 = vcmp.ge.f32.partialorder %v127_v33, 0.0  ;;  %v205_v37 = vmul.f32 0.2, %v127_v33  ;;  %vm203_vm5 = vcmp.ge.f32.partialorder %v198_v34, 0.0 }
  0xd3   :  { %v207_v38 = vmul.f32 0.2, %v198_v34 }
  0xd4   :  { %v209_v39 = vsel %vm201_vm4, %v127_v33, %v205_v37 }
  0xd5   :  { %v211_v40 = vsel %vm203_vm5, %v198_v34, %v207_v38  ;;  %213 = vst [vmem:[%s332_s3 + $0x8] sm:$0xff] %v209_v39 }
  0xd6   :  { %215 = vst [vmem:[%s332_s3 + $0x18] sm:$0xff] %v211_v40 }

// kernel: classifier_forward.8
= control target key start
LH: loop header
LB: loop body
LE: loop exit
PB: predicated region body
PF: predicated region fallthrough
CT: control target
= control target key end

     0   :  { %v148_v0 = vmov 0.0   ;;  %vm149_vm0 = vmmov 0   ;;  %v150_v3 = vmov 0   ;;  %vm30_vm1 = vcmask 588800   ;;  %s207_s1 = inlined_call_operand.vmem [shape: f32[72,128], index: 1, kind: input, shape index: {}]   ;;  %s208_s2 = inlined_call_operand.vmem [shape: f32[8,1], index: 2, kind: input, shape index: {}]   ;;  %s209_s0 = inlined_call_operand.vmem [shape: f32[8,72], index: 0, kind: input, shape index: {}]   ;;  %s210_s3 = inlined_call_operand.vmem [shape: f32[8,128], index: 3, kind: output, shape index: {}]  }
   0x1   :  { %123 = vmatprep.subr.mxu0 %v148_v0  ;;  %v23_v1 = vld [vmem:[%s207_s1 + $0x40] sm:$0xff]  ;;  %v22_v2 = vld [vmem:[%s207_s1 + $0x38] sm:$0xff]  ;;  %141 = vmatprep.mubr.msk.f32.mxu0 %vm149_vm0, %v148_v0  ;;  %v21_v4 = vld [vmem:[%s207_s1 + $0x30] sm:$0xff] }
   0x2   :  { %124 = vmatpush3.msra.mxu0 %v23_v1  ;;  %147 = vset.pattern.permute.xlu0 %v150_v3  ;;  %v24_v5 = vld [vmem:[%s208_s2] sm:$0xff]  ;;  %v20_v6 = vld [vmem:[%s207_s1 + $0x28] sm:$0xff]  ;;  %v18_v8 = vld [vmem:[%s207_s1 + $0x18] sm:$0xff] }
   0x3   :  { %125 = vmatprep.subr.mxu0 %v148_v0  ;;  %27 = vperm.xlu0 %147, %v24_v5   ;;  %v19_v7 = vld [vmem:[%s207_s1 + $0x20] sm:$0xff]  ;;  %v17_v9 = vld [vmem:[%s207_s1 + $0x10] sm:$0xff]  ;;  %v16_v10 = vld [vmem:[%s207_s1 + $0x8] sm:$0xff] }
   0x4   :  { %126 = vmatpush3.msra.mxu0 %v22_v2  ;;  %v15_v11 = vld [vmem:[%s207_s1] sm:$0xff] }
   0x5   :  { %127 = vmatprep.subr.mxu0 %v148_v0  ;;  %v14_v12 = vld [vmem:[%s209_s0] sm:$0xff] }
   0x6   :  { %128 = vmatpush3.msra.mxu0 %v21_v4 }
   0x7   :  { %129 = vmatprep.subr.mxu0 %v148_v0 }
   0x8   :  { %130 = vmatpush3.msra.mxu0 %v20_v6 }
   0x9   :  { %131 = vmatprep.subr.mxu0 %v148_v0 }
   0xa   :  { %132 = vmatpush3.msra.mxu0 %v19_v7 }
   0xb   :  { %133 = vmatprep.subr.mxu0 %v148_v0 }
   0xc   :  { %134 = vmatpush3.msra.mxu0 %v18_v8 }
   0xd   :  { %135 = vmatprep.subr.mxu0 %v148_v0 }
   0xe   :  { %136 = vmatpush3.msra.mxu0 %v17_v9 }
   0xf   :  { %137 = vmatprep.subr.mxu0 %v148_v0 }
  0x10   :  { %138 = vmatpush3.msra.mxu0 %v16_v10 }
  0x11   :  { %139 = vmatprep.subr.mxu0 %v148_v0 }
  0x12   :  { %140 = vmatpush3.msra.mxu0 %v15_v11 }
  0x13   :  { %142 = vmatmul.mubr.msk.f32.vlgmr.msra.gmra.mxu0 %vm30_vm1, %v14_v12 }
  0x7e   :  { %v28_v13 = vpop.permute.xlu0 %27 }
  0xd3   :  { %v100_v14 = vpop.f32.mrf.mxu0 }
  0xd4   :  { %v101_v15 = vadd.f32 %v100_v14, %v28_v13 }
  0xd5   :  { %v143_v16 = vpop.f32.mrf.mxu0 }
  0xd6   :  { %vm104_vm2 = vcmp.ge.f32.partialorder %v101_v15, 0.0  ;;  %v105_v17 = vmul.f32 0.2, %v101_v15 }
  0xd8   :  { %v106_v18 = vsel %vm104_vm2, %v101_v15, %v105_v17 }
  0xd9   :  { %107 = vst [vmem:[%s210_s3] sm:$0xff] %v106_v18 }

// kernel: classifier_forward.9
= control target key start
LH: loop header
LB: loop body
LE: loop exit
PB: predicated region body
PF: predicated region fallthrough
CT: control target
= control target key end

     0   :  { %v168_v2 = vmov 0   ;;  %vm37_vm0 = vcmask 588800   ;;  %vm125_vm2 = vcmask 261120   ;;  %s236_s1 = inlined_call_operand.vmem [shape: f32[72,32], index: 1, kind: input, shape index: {}]   ;;  %s237_s0 = inlined_call_operand.vmem [shape: f32[16,72], index: 0, kind: input, shape index: {}]   ;;  %s238_s2 = inlined_call_operand.vmem [shape: f32[16,1], index: 2, kind: input, shape index: {}]   ;;  %s239_s3 = inlined_call_operand.vmem [shape: f32[16,32], index: 3, kind: output, shape index: {}]  }
   0x1   :  { %v24_v0 = vld [vmem:[%s236_s1 + $0x40] sm:$0xff]  ;;  %v23_v1 = vld [vmem:[%s236_s1 + $0x38] sm:$0xff]  ;;  %167 = vset.pattern.permute.xlu0 %v168_v2  ;;  %v22_v3 = vld [vmem:[%s236_s1 + $0x30] sm:$0xff] }
   0x2   :  { %145 = vmatprep.subr.mxu0 %v24_v0  ;;  %v14_v4 = vld [vmem:[%s237_s0] sm:$0xff]  ;;  %v21_v6 = vld [vmem:[%s236_s1 + $0x28] sm:$0xff]  ;;  %v19_v9 = vld [vmem:[%s236_s1 + $0x18] sm:$0xff] }
   0x3   :  { %146 = vmatpush3.msra.mxu0 %v24_v0  ;;  %v25_v5 = vld [vmem:[%s238_s2] sm:$0xff]  ;;  %163 = vmatprep.mubr.msk.f32.mxu0 %vm37_vm0, %v14_v4  ;;  %v26_v8 = vld [vmem:[%s238_s2 + $0x8] sm:$0xff]  ;;  %v18_v10 = vld [vmem:[%s236_s1 + $0x10] sm:$0xff] }
   0x4   :  { %147 = vmatprep.subr.mxu0 %v23_v1  ;;  %29 = vperm.xlu0 %167, %v25_v5   ;;  %v20_v7 = vld [vmem:[%s236_s1 + $0x20] sm:$0xff]  ;;  %v17_v11 = vld [vmem:[%s236_s1 + $0x8] sm:$0xff] }
   0x5   :  { %148 = vmatpush3.msra.mxu0 %v23_v1  ;;  %v16_v12 = vld [vmem:[%s236_s1] sm:$0xff]  ;;  %v15_v13 = vld [vmem:[%s237_s0 + $0x8] sm:$0xff] }
   0x6   :  { %149 = vmatprep.subr.mxu0 %v22_v3 }
   0x7   :  { %150 = vmatpush3.msra.mxu0 %v22_v3 }
   0x8   :  { %151 = vmatprep.subr.mxu0 %v21_v6  ;;  %34 = vperm.xlu0 %167, %v26_v8  }
   0x9   :  { %152 = vmatpush3.msra.mxu0 %v21_v6 }
   0xa   :  { %153 = vmatprep.subr.mxu0 %v20_v7 }
   0xb   :  { %154 = vmatpush3.msra.mxu0 %v20_v7 }
   0xc   :  { %155 = vmatprep.subr.mxu0 %v19_v9 }
   0xd   :  { %156 = vmatpush3.msra.mxu0 %v19_v9 }
   0xe   :  { %157 = vmatprep.subr.mxu0 %v18_v10 }
   0xf   :  { %158 = vmatpush3.msra.mxu0 %v18_v10 }
  0x10   :  { %159 = vmatprep.subr.mxu0 %v17_v11 }
  0x11   :  { %160 = vmatpush3.msra.mxu0 %v17_v11 }
  0x12   :  { %161 = vmatprep.subr.mxu0 %v16_v12 }
  0x13   :  { %162 = vmatpush3.msra.mxu0 %v16_v12 }
  0x14   :  { %164 = vmatmul.mubr.msk.f32.vlgmr.msra.gmra.mxu0 %vm37_vm0, %v15_v13 }
  0x7f   :  { %v30_v14 = vpop.permute.xlu0 %29 }
  0x83   :  { %v35_v15 = vpop.permute.xlu0 %34 }
  0xd4   :  { %v165_v16 = vpop.f32.mrf.mxu0 }
  0xd5   :  { %v116_v17 = vadd.f32 %v165_v16, %v35_v15 }
  0xd6   :  { %v110_v18 = vpop.f32.mrf.mxu0 }
  0xd7   :  { %vm120_vm1 = vcmp.ge.f32.partialorder %v116_v17, 0.0  ;;  %v122_v19 = vmul.f32 0.2, %v116_v17  ;;  %v111_v20 = vadd.f32 %v110_v18, %v30_v14 }
  0xd9   :  { %v124_v21 = vsel %vm120_vm1, %v116_v17, %v122_v19  ;;  %vm119_vm3 = vcmp.ge.f32.partialorder %v111_v20, 0.0  ;;  %v121_v22 = vmul.f32 0.2, %v111_v20 }
  0xda   :  { %127 = vst.msk [vmem:[%s239_s3 + $0x8] sm:$0xff] %vm125_vm2, %v124_v21 }
  0xdb   :  { %v123_v23 = vsel %vm119_vm3, %v111_v20, %v121_v22 }
  0xdc   :  { %126 = vst.msk [vmem:[%s239_s3] sm:$0xff] %vm125_vm2, %v123_v23 }

// kernel: classifier_forward.10
= control target key start
LH: loop header
LB: loop body
LE: loop exit
PB: predicated region body
PF: predicated region fallthrough
CT: control target
= control target key end

     0   :  { %v184_v0 = vmov 0.0   ;;  %vm48_vm0 = vcmask 130048   ;;  %v185_v24 = vmov 0   ;;  %vm136_vm1 = vcmask 64512   ;;  %s320_s1 = inlined_call_operand.vmem [shape: f32[144,8], index: 1, kind: input, shape index: {}]   ;;  %s321_s0 = inlined_call_operand.vmem [shape: f32[16,144], index: 0, kind: input, shape index: {}]   ;;  %s322_s2 = inlined_call_operand.vmem [shape: f32[16,1], index: 2, kind: input, shape index: {}]   ;;  %s323_s3 = inlined_call_operand.vmem [shape: f32[16,8], index: 3, kind: output, shape index: {}]  }
   0x1   :  { %55 = vmatprep.subr.mxu0 %v184_v0  ;;  %145 = vmatprep.subr.mxu1 %v184_v0  ;;  %v33_v1 = vld [vmem:[%s320_s1 + $0x78] sm:$0xff]  ;;  %v32_v2 = vld [vmem:[%s320_s1 + $0x70] sm:$0xff]  ;;  %v31_v3 = vld [vmem:[%s320_s1 + $0x68] sm:$0xff] }
   0x2   :  { %56 = vmatpush1.msra.mxu0 %v33_v1  ;;  %163 = vmatpush1.msra.mxu1 %v33_v1  ;;  %v30_v4 = vld [vmem:[%s320_s1 + $0x60] sm:$0xff]  ;;  %v29_v5 = vld [vmem:[%s320_s1 + $0x58] sm:$0xff]  ;;  %v28_v6 = vld [vmem:[%s320_s1 + $0x50] sm:$0xff] }
   0x3   :  { %57 = vmatprep.subr.mxu0 %v184_v0  ;;  %146 = vmatprep.subr.mxu1 %v184_v0  ;;  %v27_v7 = vld [vmem:[%s320_s1 + $0x48] sm:$0xff]  ;;  %v26_v8 = vld [vmem:[%s320_s1 + $0x40] sm:$0xff]  ;;  %v25_v9 = vld [vmem:[%s320_s1 + $0x38] sm:$0xff] }
   0x4   :  { %58 = vmatpush1.msra.mxu0 %v32_v2  ;;  %164 = vmatpush1.msra.mxu1 %v32_v2  ;;  %v24_v10 = vld [vmem:[%s320_s1 + $0x30] sm:$0xff]  ;;  %v23_v11 = vld [vmem:[%s320_s1 + $0x28] sm:$0xff]  ;;  %v22_v12 = vld [vmem:[%s320_s1 + $0x20] sm:$0xff] }
   0x5   :  { %59 = vmatprep.subr.mxu0 %v184_v0  ;;  %147 = vmatprep.subr.mxu1 %v184_v0  ;;  %v21_v13 = vld [vmem:[%s320_s1 + $0x18] sm:$0xff]  ;;  %v20_v14 = vld [vmem:[%s320_s1 + $0x10] sm:$0xff]  ;;  %v19_v15 = vld [vmem:[%s320_s1 + $0x8] sm:$0xff] }
   0x6   :  { %60 = vmatpush1.msra.mxu0 %v31_v3  ;;  %165 = vmatpush1.msra.mxu1 %v31_v3  ;;  %v18_v16 = vld [vmem:[%s320_s1] sm:$0xff]  ;;  %v35_v17 = vld [vmem:[%s320_s1 + $0x88] sm:$0xff]  ;;  %v17_v20 = vld [vmem:[%s321_s0 + $0x18] sm:$0xff] }
   0x7   :  { %61 = vmatprep.subr.mxu0 %v184_v0  ;;  %148 = vmatprep.subr.mxu1 %v184_v0  ;;  %v34_v18 = vld [vmem:[%s320_s1 + $0x80] sm:$0xff]  ;;  %v15_v19 = vld [vmem:[%s321_s0 + $0x8] sm:$0xff]  ;;  %v16_v22 = vld [vmem:[%s321_s0 + $0x10] sm:$0xff] }
   0x8   :  { %62 = vmatpush1.msra.mxu0 %v30_v4  ;;  %166 = vmatpush1.msra.mxu1 %v30_v4  ;;  %v14_v21 = vld [vmem:[%s321_s0] sm:$0xff]  ;;  %v37_v25 = vld [vmem:[%s322_s2 + $0x8] sm:$0xff] }
   0x9   :  { %63 = vmatprep.subr.mxu0 %v184_v0  ;;  %149 = vmatprep.subr.mxu1 %v184_v0  ;;  %v36_v23 = vld [vmem:[%s322_s2] sm:$0xff] }
   0xa   :  { %64 = vmatpush1.msra.mxu0 %v29_v5  ;;  %167 = vmatpush1.msra.mxu1 %v29_v5 }
   0xb   :  { %65 = vmatprep.subr.mxu0 %v184_v0  ;;  %150 = vmatprep.subr.mxu1 %v184_v0 }
   0xc   :  { %66 = vmatpush1.msra.mxu0 %v28_v6  ;;  %168 = vmatpush1.msra.mxu1 %v28_v6 }
   0xd   :  { %67 = vmatprep.subr.mxu0 %v184_v0  ;;  %151 = vmatprep.subr.mxu1 %v184_v0 }
   0xe   :  { %68 = vmatpush1.msra.mxu0 %v27_v7  ;;  %169 = vmatpush1.msra.mxu1 %v27_v7 }
   0xf   :  { %69 = vmatprep.subr.mxu0 %v184_v0  ;;  %152 = vmatprep.subr.mxu1 %v184_v0 }
  0x10   :  { %70 = vmatpush1.msra.mxu0 %v26_v8  ;;  %170 = vmatpush1.msra.mxu1 %v26_v8 }
  0x11   :  { %71 = vmatprep.subr.mxu0 %v184_v0  ;;  %153 = vmatprep.subr.mxu1 %v184_v0 }
  0x12   :  { %72 = vmatpush1.msra.mxu0 %v25_v9  ;;  %171 = vmatpush1.msra.mxu1 %v25_v9 }
  0x13   :  { %73 = vmatprep.subr.mxu0 %v184_v0  ;;  %154 = vmatprep.subr.mxu1 %v184_v0 }
  0x14   :  { %74 = vmatpush1.msra.mxu0 %v24_v10  ;;  %172 = vmatpush1.msra.mxu1 %v24_v10 }
  0x15   :  { %75 = vmatprep.subr.mxu0 %v184_v0  ;;  %155 = vmatprep.subr.mxu1 %v184_v0 }
  0x16   :  { %76 = vmatpush1.msra.mxu0 %v23_v11  ;;  %173 = vmatpush1.msra.mxu1 %v23_v11 }
  0x17   :  { %77 = vmatprep.subr.mxu0 %v184_v0  ;;  %156 = vmatprep.subr.mxu1 %v184_v0 }
  0x18   :  { %78 = vmatpush1.msra.mxu0 %v22_v12  ;;  %174 = vmatpush1.msra.mxu1 %v22_v12 }
  0x19   :  { %79 = vmatprep.subr.mxu0 %v184_v0  ;;  %157 = vmatprep.subr.mxu1 %v184_v0 }
  0x1a   :  { %80 = vmatpush1.msra.mxu0 %v21_v13  ;;  %175 = vmatpush1.msra.mxu1 %v21_v13 }
  0x1b   :  { %81 = vmatprep.subr.mxu0 %v184_v0  ;;  %158 = vmatprep.subr.mxu1 %v184_v0 }
  0x1c   :  { %82 = vmatpush1.msra.mxu0 %v20_v14  ;;  %176 = vmatpush1.msra.mxu1 %v20_v14 }
  0x1d   :  { %83 = vmatprep.subr.mxu0 %v184_v0  ;;  %159 = vmatprep.subr.mxu1 %v184_v0 }
  0x1e   :  { %84 = vmatpush1.msra.mxu0 %v19_v15  ;;  %177 = vmatpush1.msra.mxu1 %v19_v15 }
  0x1f   :  { %85 = vmatprep.subr.mxu0 %v184_v0  ;;  %160 = vmatprep.subr.mxu1 %v184_v0 }
  0x20   :  { %86 = vmatpush1.msra.mxu0 %v18_v16  ;;  %178 = vmatpush1.msra.mxu1 %v18_v16 }
  0x21   :  { %115 = vmatprep.subr.mxu0 %v184_v0  ;;  %161 = vmatprep.subr.mxu1 %v184_v0 }
  0x22   :  { %116 = vmatpush2.msra.mxu0 %v35_v17  ;;  %179 = vmatpush2.msra.mxu1 %v35_v17 }
  0x23   :  { %117 = vmatprep.subr.mxu0 %v184_v0  ;;  %162 = vmatprep.subr.mxu1 %v184_v0 }
  0x24   :  { %118 = vmatpush2.msra.mxu0 %v34_v18  ;;  %180 = vmatpush2.msra.mxu1 %v34_v18 }
  0x25   :  { %143 = vmatprep.mubr.msk.f32.mxu0 %vm48_vm0, %v15_v19  ;;  %144 = vmatprep.mubr.msk.f32.mxu1 %vm48_vm0, %v17_v20 }
  0x26   :  { %120 = vmatmul.mubr.f32.vlgmr.msra.gmra.mxu0 %v14_v21  ;;  %125 = vmatmul.mubr.f32.vlgmr.msra.gmra.mxu1 %v16_v22 }
  0x27   :  { %183 = vset.pattern.permute.xlu0 %v185_v24 }
  0x28   :  { %40 = vperm.xlu0 %183, %v36_v23  }
  0x2c   :  { %45 = vperm.xlu0 %183, %v37_v25  }
  0xa3   :  { %v41_v26 = vpop.permute.xlu0 %40 }
  0xa7   :  { %v46_v27 = vpop.permute.xlu0 %45 }
  0xe6   :  { %v121_v28 = vpop.f32.mrf.mxu0  ;;  %v126_v29 = vpop.f32.mrf.mxu1 }
  0xe7   :  { %v122_v30 = vadd.f32 %v121_v28, %v41_v26  ;;  %v127_v31 = vadd.f32 %v126_v29, %v46_v27 }
  0xe8   :  { %v123_v32 = vpop.f32.mrf.mxu0  ;;  %v128_v33 = vpop.f32.mrf.mxu1 }
  0xe9   :  { %vm130_vm2 = vcmp.ge.f32.partialorder %v122_v30, 0.0  ;;  %v132_v34 = vmul.f32 0.2, %v122_v30  ;;  %vm131_vm3 = vcmp.ge.f32.partialorder %v127_v31, 0.0  ;;  %v133_v35 = vmul.f32 0.2, %v127_v31 }
  0xeb   :  { %v134_v36 = vsel %vm130_vm2, %v122_v30, %v132_v34  ;;  %v135_v37 = vsel %vm131_vm3, %v127_v31, %v133_v35 }
  0xec   :  { %137 = vst.msk [vmem:[%s323_s3] sm:$0xff] %vm136_vm1, %v134_v36  ;;  %138 = vst.msk [vmem:[%s323_s3 + $0x8] sm:$0xff] %vm136_vm1, %v135_v37 }

// kernel: classifier_forward.11
= control target key start
LH: loop header
LB: loop body
LE: loop exit
PB: predicated region body
PF: predicated region fallthrough
CT: control target
= control target key end

     0   :  { %v127_v0 = vmov 0.0   ;;  %v128_v3 = vmov 0   ;;  %vm40_vm0 = vcmask 130048   ;;  %vm117_vm2 = vcmask 64512   ;;  %s215_s1 = inlined_call_operand.vmem [shape: f32[144,8], index: 1, kind: input, shape index: {}]   ;;  %s216_s0 = inlined_call_operand.vmem [shape: f32[8,144], index: 0, kind: input, shape index: {}]   ;;  %s217_s2 = inlined_call_operand.vmem [shape: f32[8,1], index: 2, kind: input, shape index: {}]   ;;  %s218_s3 = inlined_call_operand.vmem [shape: f32[8,8], index: 3, kind: output, shape index: {}]  }
   0x1   :  { %44 = vmatprep.subr.mxu0 %v127_v0  ;;  %v31_v1 = vld [vmem:[%s215_s1 + $0x78] sm:$0xff]  ;;  %v30_v2 = vld [vmem:[%s215_s1 + $0x70] sm:$0xff]  ;;  %126 = vset.pattern.permute.xlu0 %v128_v3  ;;  %v29_v4 = vld [vmem:[%s215_s1 + $0x68] sm:$0xff] }
   0x2   :  { %45 = vmatpush1.msra.mxu0 %v31_v1  ;;  %v28_v5 = vld [vmem:[%s215_s1 + $0x60] sm:$0xff]  ;;  %v27_v6 = vld [vmem:[%s215_s1 + $0x58] sm:$0xff]  ;;  %v15_v7 = vld [vmem:[%s216_s0 + $0x8] sm:$0xff] }
   0x3   :  { %46 = vmatprep.subr.mxu0 %v127_v0  ;;  %v34_v8 = vld [vmem:[%s217_s2] sm:$0xff]  ;;  %123 = vmatprep.mubr.msk.f32.mxu0 %vm40_vm0, %v15_v7  ;;  %v26_v9 = vld [vmem:[%s215_s1 + $0x50] sm:$0xff]  ;;  %v25_v10 = vld [vmem:[%s215_s1 + $0x48] sm:$0xff] }
   0x4   :  { %47 = vmatpush1.msra.mxu0 %v30_v2  ;;  %37 = vperm.xlu0 %126, %v34_v8   ;;  %v24_v11 = vld [vmem:[%s215_s1 + $0x40] sm:$0xff]  ;;  %v23_v12 = vld [vmem:[%s215_s1 + $0x38] sm:$0xff]  ;;  %v22_v13 = vld [vmem:[%s215_s1 + $0x30] sm:$0xff] }
   0x5   :  { %48 = vmatprep.subr.mxu0 %v127_v0  ;;  %v21_v14 = vld [vmem:[%s215_s1 + $0x28] sm:$0xff]  ;;  %v20_v15 = vld [vmem:[%s215_s1 + $0x20] sm:$0xff]  ;;  %v19_v16 = vld [vmem:[%s215_s1 + $0x18] sm:$0xff] }
   0x6   :  { %49 = vmatpush1.msra.mxu0 %v29_v4  ;;  %v18_v17 = vld [vmem:[%s215_s1 + $0x10] sm:$0xff]  ;;  %v17_v18 = vld [vmem:[%s215_s1 + $0x8] sm:$0xff]  ;;  %v16_v19 = vld [vmem:[%s215_s1] sm:$0xff] }
   0x7   :  { %50 = vmatprep.subr.mxu0 %v127_v0  ;;  %v33_v20 = vld [vmem:[%s215_s1 + $0x88] sm:$0xff]  ;;  %v32_v21 = vld [vmem:[%s215_s1 + $0x80] sm:$0xff] }
   0x8   :  { %51 = vmatpush1.msra.mxu0 %v28_v5  ;;  %v14_v22 = vld [vmem:[%s216_s0] sm:$0xff] }
   0x9   :  { %52 = vmatprep.subr.mxu0 %v127_v0 }
   0xa   :  { %53 = vmatpush1.msra.mxu0 %v27_v6 }
   0xb   :  { %54 = vmatprep.subr.mxu0 %v127_v0 }
   0xc   :  { %55 = vmatpush1.msra.mxu0 %v26_v9 }
   0xd   :  { %56 = vmatprep.subr.mxu0 %v127_v0 }
   0xe   :  { %57 = vmatpush1.msra.mxu0 %v25_v10 }
   0xf   :  { %58 = vmatprep.subr.mxu0 %v127_v0 }
  0x10   :  { %59 = vmatpush1.msra.mxu0 %v24_v11 }
  0x11   :  { %60 = vmatprep.subr.mxu0 %v127_v0 }
  0x12   :  { %61 = vmatpush1.msra.mxu0 %v23_v12 }
  0x13   :  { %62 = vmatprep.subr.mxu0 %v127_v0 }
  0x14   :  { %63 = vmatpush1.msra.mxu0 %v22_v13 }
  0x15   :  { %64 = vmatprep.subr.mxu0 %v127_v0 }
  0x16   :  { %65 = vmatpush1.msra.mxu0 %v21_v14 }
  0x17   :  { %66 = vmatprep.subr.mxu0 %v127_v0 }
  0x18   :  { %67 = vmatpush1.msra.mxu0 %v20_v15 }
  0x19   :  { %68 = vmatprep.subr.mxu0 %v127_v0 }
  0x1a   :  { %69 = vmatpush1.msra.mxu0 %v19_v16 }
  0x1b   :  { %70 = vmatprep.subr.mxu0 %v127_v0 }
  0x1c   :  { %71 = vmatpush1.msra.mxu0 %v18_v17 }
  0x1d   :  { %72 = vmatprep.subr.mxu0 %v127_v0 }
  0x1e   :  { %73 = vmatpush1.msra.mxu0 %v17_v18 }
  0x1f   :  { %74 = vmatprep.subr.mxu0 %v127_v0 }
  0x20   :  { %75 = vmatpush1.msra.mxu0 %v16_v19 }
  0x21   :  { %104 = vmatprep.subr.mxu0 %v127_v0 }
  0x22   :  { %105 = vmatpush2.msra.mxu0 %v33_v20 }
  0x23   :  { %106 = vmatprep.subr.mxu0 %v127_v0 }
  0x24   :  { %107 = vmatpush2.msra.mxu0 %v32_v21 }
  0x25   :  { %109 = vmatmul.mubr.f32.vlgmr.msra.gmra.mxu0 %v14_v22 }
  0x7f   :  { %v38_v23 = vpop.permute.xlu0 %37 }
  0xe5   :  { %v110_v24 = vpop.f32.mrf.mxu0 }
  0xe6   :  { %v111_v25 = vadd.f32 %v110_v24, %v38_v23 }
  0xe7   :  { %v112_v26 = vpop.f32.mrf.mxu0 }
  0xe8   :  { %vm114_vm1 = vcmp.ge.f32.partialorder %v111_v25, 0.0  ;;  %v115_v27 = vmul.f32 0.2, %v111_v25 }
  0xea   :  { %v116_v28 = vsel %vm114_vm1, %v111_v25, %v115_v27 }
  0xeb   :  { %118 = vst.msk [vmem:[%s218_s3] sm:$0xff] %vm117_vm2, %v116_v28 }

</bundles_post_ra>
